<compile_context>
chip_gen: v7x
topology: tpu7x:2x2x1
jax: 0.10.0
libtpu: 0.0.40
codegen_flags: <defaults>
</compile_context>

<pallas_src>
import math
import random
from functools import partial

import jax
import jax.numpy as jnp
from jax.experimental import pallas as pl
from jax.experimental.pallas import tpu as pltpu

# ---- small config consistent with EncoderViT.__init__ shapes ----
IMG_SIZE = 16
PATCH = 4
IN_CHANS = 3
EMBED_DIM = 32
DEPTH = 2
NUM_HEADS = 4
MLP_RATIO = 4.0
NUM_PATCHES = (IMG_SIZE // PATCH) ** 2
HIDDEN = int(EMBED_DIM * MLP_RATIO)
LN_EPS = 1e-5


# ============================ in-kernel math helpers ============================

def _erf_approx(x):
    # Abramowitz & Stegun 7.1.26 polynomial, |err| < 1.5e-7.
    # TODO(synk): nn.GELU() uses exact erf; Mosaic has no erf primitive, so we use this poly.
    p = 0.3275911
    a1, a2, a3, a4, a5 = (0.254829592, -0.284496736, 1.421413741,
                          -1.453152027, 1.061405429)
    s = jnp.where(x >= 0.0, 1.0, -1.0)
    ax = jnp.abs(x)
    t = 1.0 / (1.0 + p * ax)
    poly = ((((a5 * t + a4) * t + a3) * t + a2) * t + a1) * t
    return s * (1.0 - poly * jnp.exp(-ax * ax))


def _gelu(x):
    return 0.5 * x * (1.0 + _erf_approx(x * 0.7071067811865476))


def _layernorm(x, g, b):
    mu = jnp.mean(x, axis=-1, keepdims=True)
    xc = x - mu
    var = jnp.mean(xc * xc, axis=-1, keepdims=True)
    return xc * jax.lax.rsqrt(var + LN_EPS) * g + b


def _softmax_rows(s):
    s = s - jnp.max(s, axis=-1, keepdims=True)
    e = jnp.exp(s)
    return e * pl.reciprocal(jnp.sum(e, axis=-1, keepdims=True), approx=True)


# ============================ fused transformer-stack kernel ============================

def _make_stack_kernel(depth, num_heads, scale, with_final_norm, collect_attn):
    """One grid step == one batch element through the entire block stack."""
    n_blk_refs = 12 * depth

    def kernel(*refs):
        x = refs[0][0].astype(jnp.float32)             # (T, D)
        T, D = x.shape
        hd = D // num_heads
        w = refs[1:1 + n_blk_refs]
        pos = 1 + n_blk_refs
        if with_final_norm:
            fn_w = refs[pos][...].astype(jnp.float32)
            fn_b = refs[pos + 1][...].astype(jnp.float32)
            pos += 2
        out_ref = refs[pos]

        attn_total = jnp.zeros((T, T), jnp.float32)

        for blk in range(depth):
            (n1w, n1b, qkvw, qkvb, projw, projb,
             n2w, n2b, fc1w, fc1b, fc2w, fc2b) = w[12 * blk:12 * (blk + 1)]

            # --- attention (all heads in one step, proj folded per-head) ---
            h = _layernorm(x, n1w[...], n1b[...])
            qkv = jnp.dot(h, qkvw[...], preferred_element_type=jnp.float32) + qkvb[...]
            pw = projw[...]                            # (D, D)
            attn_out = jnp.zeros((T, D), jnp.float32)
            for head in range(num_heads):
                lo = head * hd
                q = qkv[:, lo:lo + hd]                 # (T, hd)
                k = qkv[:, D + lo:D + lo + hd]         # (T, hd)
                v = qkv[:, 2 * D + lo:2 * D + lo + hd]  # (T, hd)
                # q @ k^T without materializing a transpose (MXU trans-B form).
                s = jax.lax.dot_general(
                    q, k, (((1,), (1,)), ((), ())),
                    preferred_element_type=jnp.float32) * scale
                p = _softmax_rows(s)                   # (T, T)
                if collect_attn:
                    attn_total = attn_total + p
                o_h = jnp.dot(p, v, preferred_element_type=jnp.float32)     # (T, hd)
                attn_out = attn_out + jnp.dot(
                    o_h, pw[lo:lo + hd, :], preferred_element_type=jnp.float32)
            x = x + attn_out + projb[...]

            # --- MLP ---
            h = _layernorm(x, n2w[...], n2b[...])
            hmid = _gelu(jnp.dot(h, fc1w[...],
                                 preferred_element_type=jnp.float32) + fc1b[...])
            x = x + (jnp.dot(hmid, fc2w[...],
                             preferred_element_type=jnp.float32) + fc2b[...])

        if collect_attn:
            # Head- and block-summed softmax attention; cls row/col dropped in glue.
            out_ref[0] = attn_total.astype(out_ref.dtype)
        else:
            if with_final_norm:
                x = _layernorm(x, fn_w, fn_b)
            out_ref[0] = x.astype(out_ref.dtype)

    return kernel


def _block_weight_arrays(blk):
    D, Hd = EMBED_DIM, HIDDEN
    return [blk['n1_w'].reshape(1, D), blk['n1_b'].reshape(1, D),
            blk['qkv_w'], blk['qkv_b'].reshape(1, 3 * D),
            blk['proj_w'], blk['proj_b'].reshape(1, D),
            blk['n2_w'].reshape(1, D), blk['n2_b'].reshape(1, D),
            blk['fc1_w'], blk['fc1_b'].reshape(1, Hd),
            blk['fc2_w'], blk['fc2_b'].reshape(1, D)]


def _run_stack(x, params, *, with_final_norm, collect_attn):
    B, T, D = x.shape
    wlist = []
    for blk in params['blocks']:
        wlist += _block_weight_arrays(blk)
    if with_final_norm:
        wlist += [params['norm_w'].reshape(1, D), params['norm_b'].reshape(1, D)]

    in_specs = [pl.BlockSpec((1, T, D), lambda b: (b, 0, 0))]
    # Weights use a constant index_map -> stay resident in VMEM across the grid.
    in_specs += [pl.BlockSpec(w.shape, lambda b: (0, 0)) for w in wlist]

    if collect_attn:
        out_shape = jax.ShapeDtypeStruct((B, T, T), x.dtype)
        out_spec = pl.BlockSpec((1, T, T), lambda b: (b, 0, 0))
    else:
        out_shape = jax.ShapeDtypeStruct((B, T, D), x.dtype)
        out_spec = pl.BlockSpec((1, T, D), lambda b: (b, 0, 0))

    kernel = _make_stack_kernel(DEPTH, NUM_HEADS, (D // NUM_HEADS) ** (-0.5),
                                with_final_norm, collect_attn)
    return pl.pallas_call(
        kernel,
        out_shape=out_shape,
        grid=(B,),
        in_specs=in_specs,
        out_specs=out_spec,
        compiler_params=pltpu.CompilerParams(
            dimension_semantics=("parallel",),
            vmem_limit_bytes=8 * 1024 * 1024),
    )(x, *wlist)


# ============================ patch embed kernel ============================

def _patch_embed_kernel(x_ref, w_ref, b_ref, pos_ref, o_ref):
    x = x_ref[0].astype(jnp.float32)                        # (L, C*p*p)
    y = jnp.dot(x, w_ref[...], preferred_element_type=jnp.float32) + b_ref[...]
    o_ref[0] = (y + pos_ref[0]).astype(o_ref.dtype)


def patch_embed(imgs, params):
    # Conv2d(kernel=stride=PATCH) == patchify + matmul; pos_embed[:,1:,:] fused in.
    N, C, Himg, Wimg = imgs.shape
    p = PATCH
    h, w = Himg // p, Wimg // p
    x = imgs.reshape(N, C, h, p, w, p).transpose(0, 2, 4, 1, 3, 5)
    x = x.reshape(N, h * w, C * p * p)
    L, K, D = h * w, C * p * p, EMBED_DIM
    pos = params['pos_embed'][:, 1:, :]                     # (1, L, D)
    return pl.pallas_call(
        _patch_embed_kernel,
        out_shape=jax.ShapeDtypeStruct((N, L, D), imgs.dtype),
        grid=(N,),
        in_specs=[pl.BlockSpec((1, L, K), lambda b: (b, 0, 0)),
                  pl.BlockSpec((K, D), lambda b: (0, 0)),
                  pl.BlockSpec((1, D), lambda b: (0, 0)),
                  pl.BlockSpec((1, L, D), lambda b: (0, 0, 0))],
        out_specs=pl.BlockSpec((1, L, D), lambda b: (b, 0, 0)),
        compiler_params=pltpu.CompilerParams(dimension_semantics=("parallel",)),
    )(x, params['patch_w'], params['patch_b'].reshape(1, D), pos)


# ============================ EM clustering kernel ============================

def _em_kernel(x_ref, xt_ref, mu0_ref, mu_ref, z_ref, *, stage_num, kappa):
    x = x_ref[0].astype(jnp.float32)     # (C, L)
    xt = xt_ref[0].astype(jnp.float32)   # (L, C)  (glue transpose; tiny and lowering-safe)

    def softmax_last(z):
        return _softmax_rows(z)

    def step(_, mu):
        z = softmax_last(kappa * jnp.dot(xt, mu, preferred_element_type=jnp.float32))
        z_ = z / (1e-6 + jnp.sum(z, axis=0, keepdims=True))
        m = jnp.dot(x, z_, preferred_element_type=jnp.float32)
        return m / (1e-6 + jnp.sqrt(jnp.sum(m * m, axis=0, keepdims=True)))

    mu = jax.lax.fori_loop(0, stage_num, step, mu0_ref[...].astype(jnp.float32))
    z = softmax_last(kappa * jnp.dot(xt, mu, preferred_element_type=jnp.float32))
    z = z / (1e-6 + jnp.sum(z, axis=0, keepdims=True))
    mu_ref[0] = mu.astype(mu_ref.dtype)   # (C, k); permuted to (k, C) by caller
    z_ref[0] = z.astype(z_ref.dtype)


def em(x, stage_num=10, k=3, key=None):
    # Mirrors EM() from the PyTorch source.  x: (B, C, L)
    B, C, L = x.shape
    mu0 = jax.random.normal(key, (C, k), x.dtype) * math.sqrt(2.0 / k)
    mu0 = mu0 / (1e-6 + jnp.linalg.norm(mu0, axis=0, keepdims=True))
    xt = jnp.swapaxes(x, 1, 2)
    mu, z = pl.pallas_call(
        partial(_em_kernel, stage_num=stage_num, kappa=40.0),
        out_shape=(jax.ShapeDtypeStruct((B, C, k), x.dtype),
                   jax.ShapeDtypeStruct((B, L, k), x.dtype)),
        grid=(B,),
        in_specs=[pl.BlockSpec((1, C, L), lambda b: (b, 0, 0)),
                  pl.BlockSpec((1, L, C), lambda b: (b, 0, 0)),
                  pl.BlockSpec((C, k), lambda b: (0, 0))],
        out_specs=(pl.BlockSpec((1, C, k), lambda b: (b, 0, 0)),
                   pl.BlockSpec((1, L, k), lambda b: (b, 0, 0))),
        compiler_params=pltpu.CompilerParams(dimension_semantics=("parallel",)),
    )(x, xt, mu0)
    return jnp.swapaxes(mu, 1, 2), z   # mu: (B, k, C) like torch permute(0, 2, 1)


# ============================ model glue ============================

def _prepend_cls(x, params):
    B = x.shape[0]
    cls = params['cls_token'] + params['pos_embed'][:, :1, :]
    cls = jnp.broadcast_to(cls, (B, 1, EMBED_DIM))
    return jnp.concatenate([cls, x], axis=1)


def get_features(x, params):
    # x: (N, L, D) tokens that already include pos_embed[:, 1:, :]
    tokens = _prepend_cls(x, params)
    attn_sum = _run_stack(tokens, params, with_final_norm=False, collect_attn=True)
    return attn_sum[:, 1:, 1:]   # drop the cls row/col -> (N, L, L)


def unsupervised_token_classification(x, cluster_num, params, key):
    # model_ema.ema is taken to be this model itself (synthetic, same weights)
    attn_abs_set = get_features(x, params)
    k = random.Random(0).randint(cluster_num[0], cluster_num[1])  # deterministic stand-in
    _, meta_map = em(attn_abs_set, stage_num=15, k=k, key=key)
    return jnp.argmax(meta_map, axis=-1)   # (N, L) int32


def strategy_masking_eff(x, mask_ratio, params, epoch, key):
    low, high, total_epoch = 10, 40, 300.0
    alpha = math.pow(1.0 / total_epoch * (epoch + 1), 0.5)
    cluster_idx = (high - low) * (total_epoch - epoch) / total_epoch + low
    cluster_num = [int(cluster_idx), int(cluster_idx + 2)]
    parts_num = cluster_num[1] + 1
    N, L, D = x.shape
    Wg = int(math.sqrt(L))
    len_keep = int(L * (1 - mask_ratio))

    k_em, k_grid, k_parts = jax.random.split(key, 3)
    tk_parts = unsupervised_token_classification(x, cluster_num, params, k_em)

    noise_grid = jax.random.uniform(k_grid, (2, 2), x.dtype)
    idx = jnp.arange(L)
    noise = noise_grid[(idx // Wg) % 2, idx % 2]
    noise = jnp.tile(noise[None, :], (N, 1))
    parts_noise_asign = jax.random.uniform(k_parts, (N, parts_num), x.dtype)
    parts_noise = jnp.take_along_axis(parts_noise_asign, tk_parts, axis=1)
    noise = (1 - alpha) * noise + alpha * parts_noise

    # TODO(synk): argsort / gather-based shuffling stays in plain JAX (no clean Pallas sort)
    ids_shuffle = jnp.argsort(noise, axis=1)
    ids_restore = jnp.argsort(ids_shuffle, axis=1)
    ids_keep = ids_shuffle[:, :len_keep]
    gather_idx = jnp.broadcast_to(ids_keep[:, :, None], (N, len_keep, D))
    x_masked = jnp.take_along_axis(x, gather_idx, axis=1)
    mask = jnp.ones((N, L), x.dtype).at[:, :len_keep].set(0.0)
    mask = jnp.take_along_axis(mask, ids_restore, axis=1)
    return x_masked, mask, ids_restore


def encoder_vit_forward(imgs, mask_ratio, params, epoch, key):
    x = patch_embed(imgs, params)                    # (N, L, D) with pos already added
    x, mask, ids_restore = strategy_masking_eff(x, mask_ratio, params, epoch, key)
    tokens = _prepend_cls(x, params)
    latent = _run_stack(tokens, params, with_final_norm=True, collect_attn=False)
    return latent, mask, ids_restore


# ============================ parameter init ============================

def init_params(key):
    D = EMBED_DIM
    hidden = HIDDEN
    pd = IN_CHANS * PATCH * PATCH
    ks = iter(jax.random.split(key, 4 + DEPTH * 8 + 4))

    def nrm(shape, std=0.02):
        return std * jax.random.normal(next(ks), shape, jnp.float32)

    params = {
        'patch_w': nrm((pd, D)),              # conv weight (D, C, p, p) folded to (C*p*p, D)
        'patch_b': nrm((D,)),
        'cls_token': nrm((1, 1, D)),
        'pos_embed': nrm((1, NUM_PATCHES + 1, D)),
        'norm_w': jnp.ones((D,), jnp.float32),
        'norm_b': jnp.zeros((D,), jnp.float32),
        'blocks': [],
    }
    for _ in range(DEPTH):
        params['blocks'].append({
            'n1_w': jnp.ones((D,), jnp.float32),
            'n1_b': jnp.zeros((D,), jnp.float32),
            'qkv_w': nrm((D, 3 * D)),
            'qkv_b': nrm((3 * D,)),
            'proj_w': nrm((D, D)),
            'proj_b': nrm((D,)),
            'n2_w': jnp.ones((D,), jnp.float32),
            'n2_b': jnp.zeros((D,), jnp.float32),
            'fc1_w': nrm((D, hidden)),
            'fc1_b': nrm((hidden,)),
            'fc2_w': nrm((hidden, D)),
            'fc2_b': nrm((D,)),
        })
    return params


if __name__ == "__main__":
    key = jax.random.PRNGKey(0)
    pkey, ikey, mkey = jax.random.split(key, 3)
    params = init_params(pkey)
    imgs = jax.random.normal(ikey, (2, IN_CHANS, IMG_SIZE, IMG_SIZE), jnp.float32)

    mask_ratio = 0.75
    latent, mask, ids_restore = encoder_vit_forward(
        imgs, mask_ratio=mask_ratio, params=params, epoch=250, key=mkey)
    jax.block_until_ready((latent, mask, ids_restore))

    len_keep = int(NUM_PATCHES * (1 - mask_ratio))
    assert latent.shape == (2, 1 + len_keep, EMBED_DIM)
    assert mask.shape == (2, NUM_PATCHES)
    assert ids_restore.shape == (2, NUM_PATCHES)
    print("KERNEL_OK")
</pallas_src>

<mosaic_0001>
module attributes {stable_mosaic.version = 11 : i64} {
  func.func @_patch_embed_kernel(%arg0: i32, %arg1: memref<1x16x48xf32, #tpu.memory_space<vmem>>, %arg2: memref<48x32xf32, #tpu.memory_space<vmem>>, %arg3: memref<1x32xf32, #tpu.memory_space<vmem>>, %arg4: memref<1x16x32xf32, #tpu.memory_space<vmem>>, %arg5: memref<1x16x32xf32, #tpu.memory_space<vmem>>) attributes {dimension_semantics = [#tpu.dimension_semantics<parallel>], iteration_bounds = array<i64: 2>, scalar_prefetch = 0 : i64, scratch_operands = 0 : i64, tpu.core_type = #tpu.core_type<tc>, window_params = [{transform_indices = @transform_0, window_bounds = array<i64: 1, 16, 48>}, {pipeline_mode = #tpu.pipeline_mode<synchronous>, transform_indices = @transform_1, window_bounds = array<i64: 48, 32>}, {pipeline_mode = #tpu.pipeline_mode<synchronous>, transform_indices = @transform_2, window_bounds = array<i64: 1, 32>}, {pipeline_mode = #tpu.pipeline_mode<synchronous>, transform_indices = @transform_3, window_bounds = array<i64: 1, 16, 32>}, {transform_indices = @transform_4, window_bounds = array<i64: 1, 16, 32>}]} {
    %c0 = arith.constant 0 : index
    %c0_0 = arith.constant 0 : index
    %c0_1 = arith.constant 0 : index
    %0 = vector.load %arg1[%c0, %c0_0, %c0_1] : memref<1x16x48xf32, #tpu.memory_space<vmem>>, vector<1x16x48xf32>
    %1 = vector.shape_cast %0 : vector<1x16x48xf32> to vector<16x48xf32>
    %c0_2 = arith.constant 0 : index
    %c0_3 = arith.constant 0 : index
    %2 = vector.load %arg2[%c0_2, %c0_3] : memref<48x32xf32, #tpu.memory_space<vmem>>, vector<48x32xf32>
    %cst = arith.constant dense<0.000000e+00> : vector<16x32xf32>
    %3 = tpu.matmul %1, %2, %cst {dimension_numbers = #tpu.dot_dimension_numbers<[1], [0], [0], [1], [0, 0, 1, 1], [], []>} : vector<16x48xf32>, vector<48x32xf32>, vector<16x32xf32> -> vector<16x32xf32>
    %c0_4 = arith.constant 0 : index
    %c0_5 = arith.constant 0 : index
    %4 = vector.load %arg3[%c0_4, %c0_5] : memref<1x32xf32, #tpu.memory_space<vmem>>, vector<1x32xf32>
    %5 = vector.broadcast %4 : vector<1x32xf32> to vector<16x32xf32>
    %6 = arith.addf %3, %5 : vector<16x32xf32>
    %c0_6 = arith.constant 0 : index
    %c0_7 = arith.constant 0 : index
    %c0_8 = arith.constant 0 : index
    %7 = vector.load %arg4[%c0_6, %c0_7, %c0_8] : memref<1x16x32xf32, #tpu.memory_space<vmem>>, vector<1x16x32xf32>
    %8 = vector.shape_cast %7 : vector<1x16x32xf32> to vector<16x32xf32>
    %9 = arith.addf %6, %8 : vector<16x32xf32>
    %c0_9 = arith.constant 0 : index
    %c0_10 = arith.constant 0 : index
    %c0_11 = arith.constant 0 : index
    %10 = vector.load %arg5[%c0_9, %c0_10, %c0_11] : memref<1x16x32xf32, #tpu.memory_space<vmem>>, vector<1x16x32xf32>
    %11 = vector.shape_cast %10 : vector<1x16x32xf32> to vector<16x32xf32>
    %12 = vector.shape_cast %9 : vector<16x32xf32> to vector<1x16x32xf32>
    tpu.vector_store %arg5[%c0_9, %c0_10, %c0_11], %12 {strides = array<i32>} : memref<1x16x32xf32, #tpu.memory_space<vmem>>, vector<1x16x32xf32>,
    return
  }
  func.func @transform_0(%arg0: i32) -> (i32, i32, i32) {
    %c0_i32 = arith.constant 0 : i32
    %c0_i32_0 = arith.constant 0 : i32
    %c0_i32_1 = arith.constant 0 : i32
    return %arg0, %c0_i32, %c0_i32_0 : i32, i32, i32
  }
  func.func @transform_1(%arg0: i32) -> (i32, i32) {
    %c0_i32 = arith.constant 0 : i32
    %c0_i32_0 = arith.constant 0 : i32
    %c0_i32_1 = arith.constant 0 : i32
    return %c0_i32, %c0_i32_0 : i32, i32
  }
  func.func @transform_2(%arg0: i32) -> (i32, i32) {
    %c0_i32 = arith.constant 0 : i32
    %c0_i32_0 = arith.constant 0 : i32
    %c0_i32_1 = arith.constant 0 : i32
    return %c0_i32, %c0_i32_0 : i32, i32
  }
  func.func @transform_3(%arg0: i32) -> (i32, i32, i32) {
    %c0_i32 = arith.constant 0 : i32
    %c0_i32_0 = arith.constant 0 : i32
    %c0_i32_1 = arith.constant 0 : i32
    %c0_i32_2 = arith.constant 0 : i32
    return %c0_i32, %c0_i32_0, %c0_i32_1 : i32, i32, i32
  }
  func.func @transform_4(%arg0: i32) -> (i32, i32, i32) {
    %c0_i32 = arith.constant 0 : i32
    %c0_i32_0 = arith.constant 0 : i32
    %c0_i32_1 = arith.constant 0 : i32
    return %arg0, %c0_i32, %c0_i32_0 : i32, i32, i32
  }
}

</mosaic_0001>

<bundles_post_ra>
// kernel: tpu_custom_call.1
= control target key start
LH: loop header
LB: loop body
LE: loop exit
PB: predicated region body
PF: predicated region fallthrough
CT: control target
= control target key end

     0   :  { %9 = vsyncpa [#allocation3], 0  ;;  %s691_s0 = inlined_call_operand.vmem [shape: f32[2,16,48], index: 0, kind: input, shape index: {}]   ;;  %s692_s1 = inlined_call_operand.vmem [shape: f32[48,32], index: 1, kind: input, shape index: {}]   ;;  %s693_s2 = inlined_call_operand.vmem [shape: f32[1,32], index: 2, kind: input, shape index: {}]   ;;  %s694_s3 = inlined_call_operand.vmem [shape: f32[1,16,32], index: 3, kind: input, shape index: {}]   ;;  %s695_s4 = inlined_call_operand.hbm [shape: f32[2,16,32], index: 4, kind: output, shape index: {}]  }
   0x1   :  { %11 = vsyncpa [#allocation3 + $0x1], 0  ;;  %s561_s15 = smov 0   ;;  %s563_s16 = smov 0  }
   0x2   :  { %s565_s17 = smov 0   ;;  %s567_s18 = smov 0  }
   0x3 LB: > { %s582_s19 = sadd.s32 4294967295, %s531_s18   ;;  %s376_s20 = sadd.s32 4294967294, %s531_s18   ;;  %s531_s18 = sphi %s567_s18, %s701_s18   ;;  %s527_s17 = sphi %s565_s17, %s700_s17   ;;  %s523_s16 = sphi %s563_s16, %s699_s16   ;;  %s519_s15 = sphi %s561_s15, %s698_s15  }
   0x4   : > { %s586_s21 = sadd.s32 1, %s531_s18   ;;  %s113_s22 = sadd.s32 1, %s527_s17 }
   0x5   : > { %s110_s23 = ssub.s32 %s531_s18, %s586_s21  ;;  %p123_p0 = scmp.ne.s32.totalorder %s527_s17, %s523_s16 }
   0x6   : > { %p111_p1 = scmp.eq.s32.totalorder %s110_s23, 0  ;;  %p124_p2 = scmp.eq.s32.totalorder %s582_s19, 1 }
   0x7   : > { %p129_p3 = scmp.ne.s32.totalorder %s523_s16, %s519_s15  ;;  %p130_p4 = scmp.eq.s32.totalorder %s376_s20, 1 }
   0x8   : > { %s597_s24 = scalar_select %p111_p1, %s527_s17, %s113_s22  }
   0x9   : > { %p599_p5 = por %p124_p2, %p123_p0  ;;  %p603_p6 = por %p130_p4, %p129_p3 }
   0xa   : > { %p379_p7 = scmp.ge.s32.totalorder %s531_s18, 1  ;;  %p165_p8 = scmp.lt.s32.totalorder %s531_s18, 3 }
   0xc   : > { %p166_p9 = pnand %p379_p7, %p165_p8 }
   0xd   : > { %v198_v0 = vld [vmem:[%s692_s1] sm:$0xff] (!%p166_p9)  ;;  %v199_v1 = vld [vmem:[%s692_s1 + $0x8] sm:$0xff] (!%p166_p9)  ;;  %v200_v2 = vld [vmem:[%s692_s1 + $0x10] sm:$0xff] (!%p166_p9)  ;;  %p191_p10 = scmp.lt.s32.totalorder (!%p166_p9), %s582_s19, 1  ;;  %vm211_vm0 = vcmask (!%p166_p9), 392192   ;;  %s188_s27 = sand.u32 (!%p166_p9), 1, %s523_s16  }
   0xe   : > { %169 = sbr.rel (%p166_p9) target bundleno = 260 (0x104), region = 36  ;;  %v416_v3 = vpack.c.bf16 (!%p166_p9), %v199_v1, %v198_v0  ;;  %v201_v4 = vld [vmem:[%s692_s1 + $0x18] sm:$0xff] (!%p166_p9)  ;;  %v202_v6 = vld [vmem:[%s692_s1 + $0x20] sm:$0xff] (!%p166_p9)  ;;  %v203_v7 = vld [vmem:[%s692_s1 + $0x28] sm:$0xff] (!%p166_p9)  ;;  %s380_s28 = sshll.u32 (!%p166_p9), %s188_s27, 4  ;;  %vm297_vm1 = vcmask (!%p166_p9), 261120  }
   0xf   : > { %v420_v5 = vpack.c.bf16 (!%p166_p9), %v201_v4, %v200_v2  ;;  %v424_v8 = vpack.c.bf16 (!%p166_p9), %v203_v7, %v202_v6  ;;  %v383_v11 = vld [vmem:[%s693_s2] ss:$0 sm:$0xff] (!%p166_p9)  ;;  %v294_v13 = vld [vmem:[%s694_s3 + $0x8] sm:$0xff] (!%p166_p9)  ;;  %s190_s7 = scalar_lea.vmem (!%p166_p9), [#allocation2], %s380_s28  ;;  %s392_s9 = sshll.u32 (!%p166_p9), %s582_s19, 8 }
  0x10   : > { %417 = vmatprep.subr.bf16.mxu0 (!%p166_p9), %v416_v3  ;;  %s314_s8 = sshll.u32 (!%p166_p9), %s190_s7, 4  ;;  %v293_v16 = vld [vmem:[%s694_s3] sm:$0xff] (!%p166_p9)  ;;  %s533_s22 = smov (!%p166_p9), [#allocation2]   ;;  %s648_s8 = int_to_ptr.vmem [resolvable:$true] %s314_s8 }
  0x11   : > { %419 = vmatpush3.bf16.msra.mxu0 (!%p166_p9), %v416_v3  ;;  %s469_s20 = scalar_lea.vmem (!%p166_p9), %s648_s8, 256 }
  0x12   : > { %421 = vmatprep.subr.bf16.mxu0 (!%p166_p9), %v420_v5  ;;  %p470_p11 = scmp.ne.s32.totalorder (!%p166_p9), %s648_s8, %s469_s20 }
  0x14   : > { %p471_p12 = pnand (!%p166_p9), %p470_p11, %p599_p5 }
  0x15   : > { %s192_s13 = scalar_select %p191_p10, %s582_s19, 1  ;;  %423 = vmatpush3.bf16.msra.mxu0 %v420_v5 }
  0x16   : > { %425 = vmatprep.subr.bf16.mxu0 %v424_v8  ;;  %s650_s19 = scalar_lea.sflag [#allocation3], %s188_s27  ;;  %p472_p13 = pneg %p471_p12 }
  0x17   : > { %s391_s14 = sshll.u32 %s192_s13, 4 }
  0x18   : > { %s195_s23 = scalar_lea.vmem %s691_s0, %s391_s14  ;;  %s646_s14 = scalar_lea.hbm %s695_s4, %s392_s9 }
  0x19   : > { %v196_v9 = vld [vmem:[%s195_s23] sm:$0xff]  ;;  %427 = vmatpush3.bf16.msra.mxu0 %v424_v8  ;;  %v197_v10 = vld [vmem:[%s195_s23 + $0x8] sm:$0xff]  ;;  %s473_s23 = sshll.u32 %s533_s22, 4  ;;  %s474_s23 = int_to_ptr.vmem [resolvable:$false] %s473_s23 }
  0x1a   : > { %413 = vmatprep.mubr.msk.f32.mxu0 %vm211_vm0, %v196_v9  ;;  %s475_s28 = scalar_lea.vmem %s474_s23, 512  ;;  %p476_p0 = scmp.lt.s32.totalorder %s648_s8, %s474_s23 }
  0x1b   : > { %p477_p1 = scmp.lt.s32.totalorder %s475_s28, %s469_s20 }
  0x1c   : > { %414 = vmatmul.mubr.msk.f32.vlgmr.msra.gmra.mrb[0].mxu0 %vm211_vm0, %v197_v10 }
  0x1d   : > { %p478_p2 = por %p477_p1, %p476_p0 }
  0x1f   : > { %p479_p3 = pnand %p478_p2, %p472_p13 }
  0xef   : > { %v415_v12 = vpop.f32.mrb[0].mxu0 }
  0xf0   : > { %v290_v14 = vadd.f32 %v415_v12, %v383_v11  ;;  %v284_v15 = vpop.f32.mrb[1].mxu0 }
  0xf1   : > { %v285_v17 = vadd.f32 %v383_v11, %v284_v15 }
  0xf2   : > { %v296_v18 = vadd.f32 %v294_v13, %v290_v14 }
  0xf3   : > { %v295_v19 = vadd.f32 %v293_v16, %v285_v17 }
  0xf4   : > { %299 = vst.msk [vmem:[%s190_s7 + $0x8] sm:$0xff] %vm297_vm1, %v296_v18 }
  0xf5   : > { %298 = vst.msk [vmem:[%s190_s7] sm:$0xff] %vm297_vm1, %v295_v19 }
  0xf6   : > { %482 = shalt.err (!%p479_p3)
}
  0xf7   : > { %s483_s27 = scalar_lea.hbm %s646_s14, 256  ;;  %s487_s5 = scalar_lea.hbm %s695_s4, 512 }
  0xf8   : > { %p484_p4 = scmp.ne.s32.totalorder %s646_s14, %s483_s27  ;;  %p488_p9 = scmp.lt.u32.totalorder %s646_s14, %s695_s4 }
  0xf9   : > { %p489_p10 = scmp.lt.u32.totalorder %s487_s5, %s483_s27  ;;  %p491_p12 = scmp.lt.u32.totalorder %s483_s27, %s646_s14 }
  0xfa   : > { %p485_p7 = pnand %p484_p4, %p599_p5 }
  0xfb   : > { %p490_p11 = por %p489_p10, %p488_p9 }
  0xfc   : > { %p486_p8 = pneg %p485_p7 }
  0xfd   : > { %p492_p13 = por %p491_p12, %p490_p11 }
  0xff   : > { %p493_p0 = pnand %p492_p13, %p486_p8 }
 0x101   : > { %496 = shalt.err (!%p493_p0)
}
 0x102   : > { %s534_s9 = smov 128   ;;  %s535_s10 = smov 8  }
 0x103   : > { %428 = dma.vmem_to_hbm [thread:$0]  (%p599_p5), %s648_s8, 256, %s646_s14, %s650_s19, %s534_s9, %s534_s9, %s535_s10  }
 0x104 PF: > { %p434_p1 = scmp.ge.s32.totalorder %s531_s18, 2  ;;  %s329_s11 = sand.u32 1, %s519_s15  }
 0x105   : > { %s330_s12 = scalar_lea.sflag [#allocation3], %s329_s11 }
 0x106   : > { %p431_p2 = pnand %p434_p1, %p603_p6 }
 0x108   : > { %514 = dma.done.wait (!%p431_p2), %s330_s12, 256  }
 0x109   : > { %516 = vsyncadd (!%p431_p2), %s330_s12, 4294967040  ;;  %p14_p3 = scmp.ge.s32.totalorder %s586_s21, 4   ;;  %s698_s15 = smov %s523_s16 }
 0x10a   : > { %s699_s16 = smov %s527_s17  ;;  %s700_s17 = smov %s597_s24 }
 0x10b   : > { %s701_s18 = smov %s586_s21  ;;  %16 = sbr.rel (!%p14_p3) target bundleno = 3 (0x3), region = 71 }
 0x112   :  { %335 = vsyncpa [#allocation3], 1 }
 0x113   :  { %337 = vsyncpa [#allocation3 + $0x1], 1 }

</bundles_post_ra>
